<compile_context>
chip_gen: v7x
topology: tpu7x:2x2x1
jax: 0.10.0
libtpu: 0.0.40
codegen_flags: <defaults>
</compile_context>

<pallas_src>
import jax
import jax.numpy as jnp
from jax.experimental import pallas as pl
from jax.experimental.pallas import tpu as pltpu

# Logical / padded dimensions.
IN_F = 1000   # fc1 input features (kept unpadded; full-dim block)
H1 = 100      # fc1 valid outputs
H2 = 10       # fc2 valid outputs
OUT = 5       # fc3 valid outputs
N1 = 128      # fc1 padded outputs (lane-dense)
N2 = 128      # fc2 padded outputs (lane-dense)
N3 = 8        # fc3 padded outputs (narrow output -> tiny writeback)
_NEG = -1e30  # pad bias for fc3 so padded logits vanish (exp -> exactly 0 in f32)


def mlp_kernel(x_ref, w1_ref, b1_ref, w2_ref, b2_ref, w3_ref, b3_ref, o_ref):
    # x arrives as f32 and is cast to bf16 in-register (no extra HBM pass).
    x = x_ref[...].astype(jnp.bfloat16)                               # (TB, 1000)

    # fc1 (bf16 MXU, f32 accumulate) + bias + ReLU.  Dropout = identity (eval).
    h1 = jnp.dot(x, w1_ref[...], preferred_element_type=jnp.float32) + b1_ref[...]
    h1 = jnp.maximum(h1, 0.0)                                         # (TB, 128) f32

    # fc2 + ReLU (bf16 MXU, f32 accumulate).  Dropout = identity (eval).
    h2 = jnp.dot(h1.astype(jnp.bfloat16), w2_ref[...],
                 preferred_element_type=jnp.float32) + b2_ref[...]
    h2 = jnp.maximum(h2, 0.0)                                         # (TB, 128) f32

    # fc3 (padded columns get bias -1e30 -> exp() == 0 below).
    logits = jnp.dot(h2.astype(jnp.bfloat16), w3_ref[...],
                     preferred_element_type=jnp.float32) + b3_ref[...]  # (TB, 8)

    # Softmax over features (dim=1), numerically stable, exact normalization.
    m = jnp.max(logits, axis=-1, keepdims=True)
    e = jnp.exp(logits - m)
    o_ref[...] = e / jnp.sum(e, axis=-1, keepdims=True)


def prepare_params(w1, b1, w2, b2, w3, b3):
    """Pad weights/biases to lane-dense shapes; weights in bf16 for the MXU.

    Weights are stored as (in, out) so the kernel computes y = x @ W + b,
    which equals PyTorch's x @ W.T + b for W of shape (out, in).
    Pad columns carry exact zeros (zero weight + zero bias) through ReLU;
    fc3's pad bias is -1e30 so padded logits contribute exp() == 0 to softmax.
    """
    w1p = jnp.zeros((IN_F, N1), jnp.float32).at[:, :H1].set(w1).astype(jnp.bfloat16)
    b1p = jnp.zeros((1, N1), jnp.float32).at[:, :H1].set(b1.reshape(1, -1))

    w2p = jnp.zeros((N1, N2), jnp.float32).at[:H1, :H2].set(w2).astype(jnp.bfloat16)
    b2p = jnp.zeros((1, N2), jnp.float32).at[:, :H2].set(b2.reshape(1, -1))

    w3p = jnp.zeros((N2, N3), jnp.float32).at[:H2, :OUT].set(w3).astype(jnp.bfloat16)
    b3p = jnp.full((1, N3), _NEG, jnp.float32).at[:, :OUT].set(b3.reshape(1, -1))

    return w1p, b1p, w2p, b2p, w3p, b3p


def neural_network_forward(x, padded_params, *, tb=1024):
    """x: (B, 1000) float32. Returns softmax probabilities (B, 5) float32."""
    w1p, b1p, w2p, b2p, w3p, b3p = padded_params
    B, F = x.shape
    assert F == IN_F

    if B <= tb:
        TB = B                      # single block; block dim == full dim is legal
    else:
        TB = max(8, (tb // 8) * 8)  # multiple of 8 (f32 sublane tiling)
    grid = (pl.cdiv(B, TB),)        # last tile may be partial; Pallas masks it

    out = pl.pallas_call(
        mlp_kernel,
        out_shape=jax.ShapeDtypeStruct((B, N3), jnp.float32),
        grid=grid,
        in_specs=[
            pl.BlockSpec((TB, IN_F), lambda i: (i, 0)),   # x tile, streamed
            pl.BlockSpec((IN_F, N1), lambda i: (0, 0)),   # w1, VMEM-resident
            pl.BlockSpec((1, N1), lambda i: (0, 0)),      # b1
            pl.BlockSpec((N1, N2), lambda i: (0, 0)),     # w2
            pl.BlockSpec((1, N2), lambda i: (0, 0)),      # b2
            pl.BlockSpec((N2, N3), lambda i: (0, 0)),     # w3
            pl.BlockSpec((1, N3), lambda i: (0, 0)),      # b3
        ],
        out_specs=pl.BlockSpec((TB, N3), lambda i: (i, 0)),
        compiler_params=pltpu.CompilerParams(
            dimension_semantics=("parallel",),
            vmem_limit_bytes=32 * 1024 * 1024,
        ),
    )(x, w1p, b1p, w2p, b2p, w3p, b3p)

    return out[:, :OUT]


def init_params(key):
    """Deterministic init mimicking nn.Linear's uniform(-1/sqrt(fan_in), ...)."""
    ks = jax.random.split(key, 6)

    def linear(kw, kb, fan_in, fan_out):
        bound = 1.0 / (fan_in ** 0.5)
        # stored as (in, out) so the kernel does x @ W (== PyTorch x @ W.T)
        w = jax.random.uniform(kw, (fan_in, fan_out), jnp.float32, -bound, bound)
        b = jax.random.uniform(kb, (1, fan_out), jnp.float32, -bound, bound)
        return w, b

    w1, b1 = linear(ks[0], ks[1], IN_F, H1)
    w2, b2 = linear(ks[2], ks[3], H1, H2)
    w3, b3 = linear(ks[4], ks[5], H2, OUT)
    return w1, b1, w2, b2, w3, b3


def reference_forward(x, w1, b1, w2, b2, w3, b3):
    """Pure-JAX f32 reference matching the PyTorch module in eval() mode."""
    h1 = jnp.maximum(x @ w1 + b1, 0.0)
    h2 = jnp.maximum(h1 @ w2 + b2, 0.0)
    logits = h2 @ w3 + b3
    return jax.nn.softmax(logits, axis=1)


if __name__ == "__main__":
    key = jax.random.PRNGKey(0)
    k_x, k_x2, k_p = jax.random.split(key, 3)

    raw_params = init_params(k_p)
    padded_params = prepare_params(*raw_params)

    # --- small batch (single grid step, whole-batch block) ---
    B = 8
    x = jax.random.normal(k_x, (B, IN_F), dtype=jnp.float32)
    out = jax.block_until_ready(neural_network_forward(x, padded_params))
    ref = reference_forward(x, *raw_params)

    assert out.shape == (B, OUT)
    assert jnp.allclose(jnp.sum(out, axis=1), 1.0, atol=1e-3)
    assert jnp.allclose(out, ref, atol=3e-2), "small-batch mismatch vs f32 reference"

    # --- multi-step grid with a non-divisible final tile (exercises masking) ---
    B2 = 300
    x2 = jax.random.normal(k_x2, (B2, IN_F), dtype=jnp.float32)
    out2 = jax.block_until_ready(neural_network_forward(x2, padded_params, tb=128))
    ref2 = reference_forward(x2, *raw_params)

    assert out2.shape == (B2, OUT)
    assert jnp.allclose(jnp.sum(out2, axis=1), 1.0, atol=1e-3)
    assert jnp.allclose(out2, ref2, atol=3e-2), "tiled-batch mismatch vs f32 reference"

    print("KERNEL_OK")
</pallas_src>

<mosaic_0001>
module attributes {stable_mosaic.version = 11 : i64} {
  func.func @mlp_kernel(%arg0: i32, %arg1: memref<8x1000xf32, #tpu.memory_space<vmem>>, %arg2: memref<1000x128xbf16, #tpu.memory_space<vmem>>, %arg3: memref<1x128xf32, #tpu.memory_space<vmem>>, %arg4: memref<128x128xbf16, #tpu.memory_space<vmem>>, %arg5: memref<1x128xf32, #tpu.memory_space<vmem>>, %arg6: memref<128x8xbf16, #tpu.memory_space<vmem>>, %arg7: memref<1x8xf32, #tpu.memory_space<vmem>>, %arg8: memref<8x8xf32, #tpu.memory_space<vmem>>) attributes {dimension_semantics = [#tpu.dimension_semantics<parallel>], iteration_bounds = array<i64: 1>, scalar_prefetch = 0 : i64, scratch_operands = 0 : i64, tpu.core_type = #tpu.core_type<tc>, window_params = [{transform_indices = @transform_0, window_bounds = array<i64: 8, 1000>}, {pipeline_mode = #tpu.pipeline_mode<synchronous>, transform_indices = @transform_1, window_bounds = array<i64: 1000, 128>}, {pipeline_mode = #tpu.pipeline_mode<synchronous>, transform_indices = @transform_2, window_bounds = array<i64: 1, 128>}, {pipeline_mode = #tpu.pipeline_mode<synchronous>, transform_indices = @transform_3, window_bounds = array<i64: 128, 128>}, {pipeline_mode = #tpu.pipeline_mode<synchronous>, transform_indices = @transform_4, window_bounds = array<i64: 1, 128>}, {pipeline_mode = #tpu.pipeline_mode<synchronous>, transform_indices = @transform_5, window_bounds = array<i64: 128, 8>}, {pipeline_mode = #tpu.pipeline_mode<synchronous>, transform_indices = @transform_6, window_bounds = array<i64: 1, 8>}, {transform_indices = @transform_7, window_bounds = array<i64: 8, 8>}]} {
    %c0 = arith.constant 0 : index
    %c0_0 = arith.constant 0 : index
    %0 = vector.load %arg1[%c0, %c0_0] : memref<8x1000xf32, #tpu.memory_space<vmem>>, vector<8x1000xf32>
    %1 = arith.truncf %0 : vector<8x1000xf32> to vector<8x1000xbf16>
    %c0_1 = arith.constant 0 : index
    %c0_2 = arith.constant 0 : index
    %2 = vector.load %arg2[%c0_1, %c0_2] : memref<1000x128xbf16, #tpu.memory_space<vmem>>, vector<1000x128xbf16>
    %cst = arith.constant dense<0.000000e+00> : vector<8x128xf32>
    %3 = tpu.matmul %1, %2, %cst {dimension_numbers = #tpu.dot_dimension_numbers<[1], [0], [0], [1], [0, 0, 1, 1], [], []>} : vector<8x1000xbf16>, vector<1000x128xbf16>, vector<8x128xf32> -> vector<8x128xf32>
    %c0_3 = arith.constant 0 : index
    %c0_4 = arith.constant 0 : index
    %4 = vector.load %arg3[%c0_3, %c0_4] : memref<1x128xf32, #tpu.memory_space<vmem>>, vector<1x128xf32>
    %5 = vector.broadcast %4 : vector<1x128xf32> to vector<8x128xf32>
    %6 = arith.addf %3, %5 : vector<8x128xf32>
    %cst_5 = arith.constant 0.000000e+00 : f32
    %7 = vector.broadcast %cst_5 : f32 to vector<8x128xf32>
    %8 = arith.maximumf %6, %7 : vector<8x128xf32>
    %9 = arith.truncf %8 : vector<8x128xf32> to vector<8x128xbf16>
    %c0_6 = arith.constant 0 : index
    %c0_7 = arith.constant 0 : index
    %10 = vector.load %arg4[%c0_6, %c0_7] : memref<128x128xbf16, #tpu.memory_space<vmem>>, vector<128x128xbf16>
    %cst_8 = arith.constant dense<0.000000e+00> : vector<8x128xf32>
    %11 = tpu.matmul %9, %10, %cst_8 {dimension_numbers = #tpu.dot_dimension_numbers<[1], [0], [0], [1], [0, 0, 1, 1], [], []>} : vector<8x128xbf16>, vector<128x128xbf16>, vector<8x128xf32> -> vector<8x128xf32>
    %c0_9 = arith.constant 0 : index
    %c0_10 = arith.constant 0 : index
    %12 = vector.load %arg5[%c0_9, %c0_10] : memref<1x128xf32, #tpu.memory_space<vmem>>, vector<1x128xf32>
    %13 = vector.broadcast %12 : vector<1x128xf32> to vector<8x128xf32>
    %14 = arith.addf %11, %13 : vector<8x128xf32>
    %cst_11 = arith.constant 0.000000e+00 : f32
    %15 = vector.broadcast %cst_11 : f32 to vector<8x128xf32>
    %16 = arith.maximumf %14, %15 : vector<8x128xf32>
    %17 = arith.truncf %16 : vector<8x128xf32> to vector<8x128xbf16>
    %c0_12 = arith.constant 0 : index
    %c0_13 = arith.constant 0 : index
    %18 = vector.load %arg6[%c0_12, %c0_13] : memref<128x8xbf16, #tpu.memory_space<vmem>>, vector<128x8xbf16>
    %cst_14 = arith.constant dense<0.000000e+00> : vector<8x8xf32>
    %19 = tpu.matmul %17, %18, %cst_14 {dimension_numbers = #tpu.dot_dimension_numbers<[1], [0], [0], [1], [0, 0, 1, 1], [], []>} : vector<8x128xbf16>, vector<128x8xbf16>, vector<8x8xf32> -> vector<8x8xf32>
    %c0_15 = arith.constant 0 : index
    %c0_16 = arith.constant 0 : index
    %20 = vector.load %arg7[%c0_15, %c0_16] : memref<1x8xf32, #tpu.memory_space<vmem>>, vector<1x8xf32>
    %21 = vector.broadcast %20 : vector<1x8xf32> to vector<8x8xf32>
    %22 = arith.addf %19, %21 : vector<8x8xf32>
    %cst_17 = arith.constant dense<0xFF800000> : vector<8xf32>
    %23 = vector.multi_reduction <maximumf>, %22, %cst_17 [1] : vector<8x8xf32> to vector<8xf32>
    %24 = vector.shape_cast %23 : vector<8xf32> to vector<8x1xf32>
    %25 = vector.broadcast %24 : vector<8x1xf32> to vector<8x8xf32>
    %26 = arith.subf %22, %25 : vector<8x8xf32>
    %27 = math.exp %26 : vector<8x8xf32>
    %cst_18 = arith.constant dense<0.000000e+00> : vector<8xf32>
    %28 = vector.multi_reduction <add>, %27, %cst_18 [1] : vector<8x8xf32> to vector<8xf32>
    %29 = vector.shape_cast %28 : vector<8xf32> to vector<8x1xf32>
    %30 = vector.broadcast %29 : vector<8x1xf32> to vector<8x8xf32>
    %31 = arith.divf %27, %30 : vector<8x8xf32>
    %c0_19 = arith.constant 0 : index
    %c0_20 = arith.constant 0 : index
    %32 = vector.load %arg8[%c0_19, %c0_20] : memref<8x8xf32, #tpu.memory_space<vmem>>, vector<8x8xf32>
    tpu.vector_store %arg8[%c0_19, %c0_20], %31 {strides = array<i32>} : memref<8x8xf32, #tpu.memory_space<vmem>>, vector<8x8xf32>,
    return
  }
  func.func @transform_0(%arg0: i32) -> (i32, i32) {
    %c0_i32 = arith.constant 0 : i32
    %c0_i32_0 = arith.constant 0 : i32
    return %arg0, %c0_i32 : i32, i32
  }
  func.func @transform_1(%arg0: i32) -> (i32, i32) {
    %c0_i32 = arith.constant 0 : i32
    %c0_i32_0 = arith.constant 0 : i32
    %c0_i32_1 = arith.constant 0 : i32
    return %c0_i32, %c0_i32_0 : i32, i32
  }
  func.func @transform_2(%arg0: i32) -> (i32, i32) {
    %c0_i32 = arith.constant 0 : i32
    %c0_i32_0 = arith.constant 0 : i32
    %c0_i32_1 = arith.constant 0 : i32
    return %c0_i32, %c0_i32_0 : i32, i32
  }
  func.func @transform_3(%arg0: i32) -> (i32, i32) {
    %c0_i32 = arith.constant 0 : i32
    %c0_i32_0 = arith.constant 0 : i32
    %c0_i32_1 = arith.constant 0 : i32
    return %c0_i32, %c0_i32_0 : i32, i32
  }
  func.func @transform_4(%arg0: i32) -> (i32, i32) {
    %c0_i32 = arith.constant 0 : i32
    %c0_i32_0 = arith.constant 0 : i32
    %c0_i32_1 = arith.constant 0 : i32
    return %c0_i32, %c0_i32_0 : i32, i32
  }
  func.func @transform_5(%arg0: i32) -> (i32, i32) {
    %c0_i32 = arith.constant 0 : i32
    %c0_i32_0 = arith.constant 0 : i32
    %c0_i32_1 = arith.constant 0 : i32
    return %c0_i32, %c0_i32_0 : i32, i32
  }
  func.func @transform_6(%arg0: i32) -> (i32, i32) {
    %c0_i32 = arith.constant 0 : i32
    %c0_i32_0 = arith.constant 0 : i32
    %c0_i32_1 = arith.constant 0 : i32
    return %c0_i32, %c0_i32_0 : i32, i32
  }
  func.func @transform_7(%arg0: i32) -> (i32, i32) {
    %c0_i32 = arith.constant 0 : i32
    %c0_i32_0 = arith.constant 0 : i32
    return %arg0, %c0_i32 : i32, i32
  }
}

</mosaic_0001>

<bundles_post_ra>
// kernel: tpu_custom_call.1
= control target key start
LH: loop header
LB: loop body
LE: loop exit
PB: predicated region body
PF: predicated region fallthrough
CT: control target
= control target key end

     0   :  { %12 = vsyncpa [#allocation3], 0  ;;  %s1549_s0 = inlined_call_operand.vmem [shape: f32[8,1000], index: 0, kind: input, shape index: {}]   ;;  %s1550_s1 = inlined_call_operand.hbm [shape: bf16[1000,128], index: 1, kind: input, shape index: {}]   ;;  %s1551_s2 = inlined_call_operand.vmem [shape: f32[1,128], index: 2, kind: input, shape index: {}]   ;;  %s1552_s3 = inlined_call_operand.hbm [shape: bf16[128,128], index: 3, kind: input, shape index: {}]   ;;  %s1553_s4 = inlined_call_operand.vmem [shape: f32[1,128], index: 4, kind: input, shape index: {}]   ;;  %s1554_s5 = inlined_call_operand.vmem [shape: bf16[128,8], index: 5, kind: input, shape index: {}]   ;;  %s1555_s6 = inlined_call_operand.vmem [shape: f32[1,8], index: 6, kind: input, shape index: {}]   ;;  %s1556_s7 = inlined_call_operand.hbm [shape: f32[8,8], index: 7, kind: output, shape index: {}]  }
   0x1   :  { %13 = vsyncpa [#allocation6], 0 }
   0x2   :  { %14 = vsyncpa [#allocation4], 0  ;;  %s1372_s24 = smov [#allocation2]   ;;  %s1300_s28 = scalar_lea.hbm %s1550_s1, 8000 }
   0x3   :  { %s22_s25 = sshll.u32 %s1372_s24, 4  ;;  %p1301_p0 = scmp.ne.s32.totalorder %s1550_s1, %s1300_s28  ;;  %s23_s25 = int_to_ptr.vmem [resolvable:$true] %s22_s25 }
   0x4   :  { %p1304_p1 = scmp.lt.u32.totalorder %s1300_s28, %s1550_s1 }
   0x6   :  { %p1306_p2 = pnand %p1304_p1, %p1301_p0 }
   0x8   :  { %1309 = shalt.err (!%p1306_p2)
}
   0x9   :  { %s1310_s10 = scalar_lea.vmem %s23_s25, 8000  ;;  %p1315_p4 = scmp.lt.s32.totalorder %s23_s25, %s23_s25 }
   0xa   :  { %p1311_p3 = scmp.ne.s32.totalorder %s23_s25, %s1310_s10  ;;  %p1316_p5 = scmp.lt.s32.totalorder %s1310_s10, %s1310_s10 }
   0xc   :  { %p1317_p6 = por %p1316_p5, %p1315_p4 }
   0xe   :  { %p1318_p7 = pnand %p1317_p6, %p1311_p3 }
  0x10   :  { %1321 = shalt.err (!%p1318_p7)
}
  0x11   :  { %s1373_s11 = smov 64   ;;  %s1374_s12 = smov 4  }
  0x12   :  { %28 = dma.hbm_to_vmem [thread:$0]  %s1550_s1, 8000, %s23_s25, [#allocation3], %s1373_s11, %s1373_s11, %s1374_s12  }
  0x13   :  { %s1375_s15 = smov [#allocation5]   ;;  %s1322_s19 = scalar_lea.hbm %s1552_s3, 1024 }
  0x14   :  { %s36_s16 = sshll.u32 %s1375_s15, 4  ;;  %p1323_p8 = scmp.ne.s32.totalorder %s1552_s3, %s1322_s19  ;;  %s37_s16 = int_to_ptr.vmem [resolvable:$true] %s36_s16 }
  0x15   :  { %p1326_p9 = scmp.lt.u32.totalorder %s1322_s19, %s1552_s3 }
  0x17   :  { %p1328_p10 = pnand %p1326_p9, %p1323_p8 }
  0x19   :  { %1331 = shalt.err (!%p1328_p10)
}
  0x1a   :  { %s1332_s24 = scalar_lea.vmem %s37_s16, 1024  ;;  %p1337_p12 = scmp.lt.s32.totalorder %s37_s16, %s37_s16 }
  0x1b   :  { %p1333_p11 = scmp.ne.s32.totalorder %s37_s16, %s1332_s24  ;;  %p1338_p13 = scmp.lt.s32.totalorder %s1332_s24, %s1332_s24 }
  0x1d   :  { %p1339_p0 = por %p1338_p13, %p1337_p12 }
  0x1f   :  { %p1340_p1 = pnand %p1339_p0, %p1333_p11 }
  0x21   :  { %1343 = shalt.err (!%p1340_p1)
}
  0x22   :  { %42 = dma.hbm_to_vmem [thread:$0]  %s1552_s3, 1024, %s37_s16, [#allocation6], %s1373_s11, %s1373_s11, %s1374_s12  }
  0x23   :  { %1366 = dma.done.wait [#allocation3], 8000  }
  0x24   :  { %1367 = vsyncadd [#allocation3], 4294959296 }
  0x25   :  { %1368 = dma.done.wait [#allocation6], 1024  }
  0x26   :  { %1369 = vsyncadd [#allocation6], 4294966272  ;;  %v1217_v0 = vld [vmem:[#allocation2 + $0x40] sm:$0xff]   ;;  %v1221_v4 = vld [vmem:[#allocation2 + $0x48] sm:$0xff]   ;;  %v1376_v41 = vmov 0   ;;  %vm579_vm0 = vcmask 850944  }
  0x27   :  { %v1218_v1 = vld [vmem:[#allocation2 + $0xc0] sm:$0xff]   ;;  %1085 = vmatprep.subr.bf16.mxu0 %v1217_v0  ;;  %v1222_v5 = vld [vmem:[#allocation2 + $0xc8] sm:$0xff]   ;;  %v1225_v8 = vld [vmem:[#allocation2 + $0x50] sm:$0xff]   ;;  %vm583_vm1 = vcmask 1043456   ;;  %vm1378_vm2 = vmmov 0   ;;  %vm973_vm3 = vcmask 64512  }
  0x28   :  { %v1219_v2 = vld [vmem:[#allocation2] sm:$0xff]   ;;  %1107 = vmatprep.subr.bf16.mxu1 %v1218_v1  ;;  %v1223_v6 = vld [vmem:[#allocation2 + $0x8] sm:$0xff]   ;;  %v1226_v9 = vld [vmem:[#allocation2 + $0xd0] sm:$0xff]  }
  0x29   :  { %v1220_v3 = vld [vmem:[#allocation2 + $0x80] sm:$0xff]   ;;  %1086 = vmatpush3.bf16.msra.mxu0 %v1219_v2  ;;  %v1224_v7 = vld [vmem:[#allocation2 + $0x88] sm:$0xff]   ;;  %v1227_v10 = vld [vmem:[#allocation2 + $0x10] sm:$0xff]  }
  0x2a   :  { %1108 = vmatpush3.bf16.msra.mxu1 %v1220_v3  ;;  %1087 = vmatprep.subr.bf16.mxu0 %v1221_v4  ;;  %v1228_v11 = vld [vmem:[#allocation2 + $0x90] sm:$0xff]   ;;  %v1229_v12 = vld [vmem:[#allocation2 + $0x58] sm:$0xff]   ;;  %v1233_v16 = vld [vmem:[#allocation2 + $0x60] sm:$0xff]  }
  0x2b   :  { %1109 = vmatprep.subr.bf16.mxu1 %v1222_v5  ;;  %v1230_v13 = vld [vmem:[#allocation2 + $0xd8] sm:$0xff]   ;;  %v1234_v17 = vld [vmem:[#allocation2 + $0xe0] sm:$0xff]   ;;  %v1237_v20 = vld [vmem:[#allocation2 + $0x68] sm:$0xff]  }
  0x2c   :  { %v1231_v14 = vld [vmem:[#allocation2 + $0x18] sm:$0xff]   ;;  %v1235_v18 = vld [vmem:[#allocation2 + $0x20] sm:$0xff]   ;;  %v1238_v21 = vld [vmem:[#allocation2 + $0xe8] sm:$0xff]  }
  0x2d   :  { %1088 = vmatpush3.bf16.msra.mxu0 %v1223_v6  ;;  %v1232_v15 = vld [vmem:[#allocation2 + $0x98] sm:$0xff]   ;;  %v1236_v19 = vld [vmem:[#allocation2 + $0xa0] sm:$0xff]   ;;  %v1239_v22 = vld [vmem:[#allocation2 + $0x28] sm:$0xff]  }
  0x2e   :  { %1110 = vmatpush3.bf16.msra.mxu1 %v1224_v7  ;;  %1089 = vmatprep.subr.bf16.mxu0 %v1225_v8  ;;  %v1240_v23 = vld [vmem:[#allocation2 + $0xa8] sm:$0xff]   ;;  %v1241_v24 = vld [vmem:[#allocation2 + $0x70] sm:$0xff]   ;;  %v1245_v28 = vld [vmem:[#allocation2 + $0x78] sm:$0xff]  }
  0x2f   :  { %1111 = vmatprep.subr.bf16.mxu1 %v1226_v9  ;;  %v1242_v25 = vld [vmem:[#allocation2 + $0xf0] sm:$0xff]   ;;  %v1246_v29 = vld [vmem:[#allocation2 + $0xf8] sm:$0xff]   ;;  %v57_v32 = vld [vmem:[%s1549_s0 + $0x8] sm:$0xff] }
  0x30   :  { %v1243_v26 = vld [vmem:[#allocation2 + $0x30] sm:$0xff]   ;;  %v1247_v30 = vld [vmem:[#allocation2 + $0x38] sm:$0xff]   ;;  %v56_v34 = vld [vmem:[%s1549_s0] sm:$0xff]  ;;  %v65_v35 = vpack.c.bf16 %v57_v32, %v57_v32 }
  0x31   :  { %1090 = vmatpush3.bf16.msra.mxu0 %v1227_v10  ;;  %v1244_v27 = vld [vmem:[#allocation2 + $0xb0] sm:$0xff]   ;;  %v1248_v31 = vld [vmem:[#allocation2 + $0xb8] sm:$0xff]   ;;  %v64_v37 = vpack.c.bf16 %v56_v34, %v56_v34  ;;  %v1249_v40 = vld [vmem:[#allocation2 + $0x140] sm:$0xff]  }
  0x32   :  { %1112 = vmatpush3.bf16.msra.mxu1 %v1228_v11  ;;  %1091 = vmatprep.subr.bf16.mxu0 %v1229_v12  ;;  %v59_v33 = vld [vmem:[%s1549_s0 + $0x18] sm:$0xff]  ;;  %v58_v38 = vld [vmem:[%s1549_s0 + $0x10] sm:$0xff]  ;;  %v1250_v42 = vld [vmem:[#allocation2 + $0x100] sm:$0xff]  }
  0x33   :  { %1113 = vmatprep.subr.bf16.mxu1 %v1230_v13  ;;  %v67_v36 = vpack.c.bf16 %v59_v33, %v59_v33  ;;  %v66_v39 = vpack.c.bf16 %v58_v38, %v58_v38  ;;  %619 = vmatprep.mubr.bf16.mxu0 %v65_v35  ;;  %v1251_v43 = vld [vmem:[#allocation2 + $0x180] sm:$0xff]   ;;  %v1252_v44 = vld [vmem:[#allocation2 + $0x148] sm:$0xff]   ;;  %v1255_v47 = vld [vmem:[#allocation2 + $0x150] sm:$0xff]  }
  0x34   :  { %v1253_v45 = vld [vmem:[#allocation2 + $0x108] sm:$0xff]   ;;  %v1256_v48 = vld [vmem:[#allocation2 + $0x110] sm:$0xff]   ;;  %v1258_v50 = vld [vmem:[#allocation2 + $0x158] sm:$0xff]  }
  0x35   :  { %1092 = vmatpush3.bf16.msra.mxu0 %v1231_v14  ;;  %659 = vmatprep.mubr.bf16.mxu1 %v67_v36  ;;  %v1254_v46 = vld [vmem:[#allocation2 + $0x188] sm:$0xff]   ;;  %v1257_v49 = vld [vmem:[#allocation2 + $0x190] sm:$0xff]   ;;  %v1259_v51 = vld [vmem:[#allocation2 + $0x118] sm:$0xff]  }
  0x36   :  { %1114 = vmatpush3.bf16.msra.mxu1 %v1232_v15  ;;  %1093 = vmatprep.subr.bf16.mxu0 %v1233_v16  ;;  %v1260_v52 = vld [vmem:[#allocation2 + $0x198] sm:$0xff]   ;;  %v1261_v53 = vld [vmem:[#allocation2 + $0x160] sm:$0xff]   ;;  %v1264_v56 = vld [vmem:[#allocation2 + $0x168] sm:$0xff]  }
  0x37   :  { %1115 = vmatprep.subr.bf16.mxu1 %v1234_v17  ;;  %v1262_v54 = vld [vmem:[#allocation2 + $0x120] sm:$0xff]   ;;  %v1265_v57 = vld [vmem:[#allocation2 + $0x128] sm:$0xff]   ;;  %v1267_v59 = vld [vmem:[#allocation2 + $0x170] sm:$0xff]  }
  0x38   :  { %v1263_v55 = vld [vmem:[#allocation2 + $0x1a0] sm:$0xff]   ;;  %v1266_v58 = vld [vmem:[#allocation2 + $0x1a8] sm:$0xff]   ;;  %v1268_v60 = vld [vmem:[#allocation2 + $0x130] sm:$0xff]  }
  0x39   :  { %1094 = vmatpush3.bf16.msra.mxu0 %v1235_v18  ;;  %v61_v61 = vld [vmem:[%s1549_s0 + $0x28] sm:$0xff]  ;;  %v1269_v62 = vld [vmem:[#allocation2 + $0x1b0] sm:$0xff]   ;;  %v1270_v0 = vld [vmem:[#allocation2 + $0x178] sm:$0xff]   ;;  %v1377_v18 = vmov 0.0  }
  0x3a   :  { %1116 = vmatpush3.bf16.msra.mxu1 %v1236_v19  ;;  %1095 = vmatprep.subr.bf16.mxu0 %v1237_v20  ;;  %v69_v63 = vpack.c.bf16 %v61_v61, %v61_v61  ;;  %v1271_v1 = vld [vmem:[#allocation2 + $0x138] sm:$0xff]   ;;  %v60_v3 = vld [vmem:[%s1549_s0 + $0x20] sm:$0xff]  ;;  %v1274_v8 = vld [vmem:[#allocation2 + $0x1c8] sm:$0xff]  }
  0x3b   :  { %1117 = vmatprep.subr.bf16.mxu1 %v1238_v21  ;;  %v1272_v2 = vld [vmem:[#allocation2 + $0x1b8] sm:$0xff]   ;;  %v68_v5 = vpack.c.bf16 %v60_v3, %v60_v3  ;;  %v1273_v7 = vld [vmem:[#allocation2 + $0x1c0] sm:$0xff]   ;;  %v1275_v9 = vld [vmem:[#allocation2 + $0x1d0] sm:$0xff]  }
  0x3c   :  { %v63_v4 = vld [vmem:[%s1549_s0 + $0x38] sm:$0xff]  ;;  %v1277_v11 = vld [vmem:[#allocation2 + $0x1e0] sm:$0xff]   ;;  %v1278_v12 = vld [vmem:[#allocation2 + $0x1e8] sm:$0xff]  }
  0x3d   :  { %1096 = vmatpush3.bf16.msra.mxu0 %v1239_v22  ;;  %v71_v6 = vpack.c.bf16 %v63_v4, %v63_v4  ;;  %v1276_v10 = vld [vmem:[#allocation2 + $0x1d8] sm:$0xff]   ;;  %v1279_v13 = vld [vmem:[#allocation2 + $0x1f0] ss:$0 sps:$4 sm:$0xff]   ;;  %v1282_v20 = vld [vmem:[#allocation5 + $0x10] sm:$0xff]  }
  0x3e   :  { %1118 = vmatpush3.bf16.msra.mxu1 %v1240_v23  ;;  %1097 = vmatprep.subr.bf16.mxu0 %v1241_v24  ;;  %v62_v14 = vld [vmem:[%s1549_s0 + $0x30] sm:$0xff]  ;;  %v585_v15 = vsel %vm583_vm1, %v1279_v13, 0  ;;  %v1281_v19 = vld [vmem:[#allocation5 + $0x8] sm:$0xff]   ;;  %v1286_v24 = vld [vmem:[#allocation5 + $0x30] sm:$0xff]  }
  0x3f   :  { %1119 = vmatprep.subr.bf16.mxu1 %v1242_v25  ;;  %v70_v16 = vpack.c.bf16 %v62_v14, %v62_v14  ;;  %v1280_v17 = vld [vmem:[#allocation5] sm:$0xff]   ;;  %v1283_v21 = vld [vmem:[#allocation5 + $0x18] sm:$0xff]   ;;  %v1285_v23 = vld [vmem:[#allocation5 + $0x28] sm:$0xff]  }
  0x40   :  { %v1284_v22 = vld [vmem:[#allocation5 + $0x20] sm:$0xff]   ;;  %v1287_v25 = vld [vmem:[#allocation5 + $0x38] sm:$0xff]   ;;  %v1002_v34 = vld [vmem:[%s1551_s2] ss:$0 sm:$0xff] }
  0x41   :  { %1098 = vmatpush3.bf16.msra.mxu0 %v1243_v26  ;;  %v1288_v26 = vld [vmem:[%s1554_s5] sm:$0xff]  }
  0x42   :  { %1120 = vmatpush3.bf16.msra.mxu1 %v1244_v27  ;;  %1099 = vmatprep.subr.bf16.mxu0 %v1245_v28  ;;  %v1289_v27 = vld [vmem:[%s1554_s5 + $0x8] sm:$0xff]   ;;  %v1290_v28 = vld [vmem:[%s1554_s5 + $0x10] sm:$0xff]   ;;  %v1076_v4 = vld [vmem:[%s1555_s6] ss:$0 sm:$0xff] }
  0x43   :  { %1121 = vmatprep.subr.bf16.mxu1 %v1246_v29  ;;  %v1291_v29 = vld [vmem:[%s1554_s5 + $0x18] sm:$0xff]  }
  0x45   :  { %1100 = vmatpush3.bf16.msra.mxu0 %v1247_v30  ;;  %v1292_v30 = vld [vmem:[%s1554_s5 + $0x20] sm:$0xff]  }
  0x46   :  { %1122 = vmatpush3.bf16.msra.mxu1 %v1248_v31  ;;  %1129 = vmatprep.subr.bf16.mxu0 %v1249_v40  ;;  %v1293_v31 = vld [vmem:[%s1554_s5 + $0x28] sm:$0xff]  }
  0x47   :  { %707 = vmatprep.subr.bf16.mxu1 %v1376_v41 }
  0x48   :  { %620 = vmatmul.mubr.bf16.vlgmr.msra.gmra.mrb[0].mxu0 %v64_v37 }
  0x49   :  { %660 = vmatmul.mubr.bf16.vlgmr.msra.gmra.mrb[0].mxu1 %v66_v39  ;;  %1130 = vmatpush3.bf16.msra.mxu0 %v1250_v42 }
  0x4a   :  { %708 = vmatpush1.bf16.msra.mxu1 %v1251_v43  ;;  %1131 = vmatprep.subr.bf16.mxu0 %v1252_v44 }
  0x4b   :  { %709 = vmatprep.subr.bf16.mxu1 %v1376_v41  ;;  %699 = vmatprep.mubr.bf16.mxu0 %v69_v63 }
  0x4c   :  { %1066 = vmatprep.mubr.msk.bf16.mxu1 %vm579_vm0, %v71_v6 }
  0x4d   :  { %1132 = vmatpush3.bf16.msra.mxu0 %v1253_v45 }
  0x4e   :  { %710 = vmatpush1.bf16.msra.mxu1 %v1254_v46  ;;  %1133 = vmatprep.subr.bf16.mxu0 %v1255_v47 }
  0x4f   :  { %711 = vmatprep.subr.bf16.mxu1 %v1376_v41 }
  0x51   :  { %1134 = vmatpush3.bf16.msra.mxu0 %v1256_v48 }
  0x52   :  { %712 = vmatpush1.bf16.msra.mxu1 %v1257_v49  ;;  %1135 = vmatprep.subr.bf16.mxu0 %v1258_v50 }
  0x53   :  { %713 = vmatprep.subr.bf16.mxu1 %v1376_v41 }
  0x55   :  { %1136 = vmatpush3.bf16.msra.mxu0 %v1259_v51 }
  0x56   :  { %714 = vmatpush1.bf16.msra.mxu1 %v1260_v52  ;;  %1137 = vmatprep.subr.bf16.mxu0 %v1261_v53 }
  0x57   :  { %715 = vmatprep.subr.bf16.mxu1 %v1376_v41 }
  0x59   :  { %1138 = vmatpush3.bf16.msra.mxu0 %v1262_v54 }
  0x5a   :  { %716 = vmatpush1.bf16.msra.mxu1 %v1263_v55  ;;  %1139 = vmatprep.subr.bf16.mxu0 %v1264_v56 }
  0x5b   :  { %717 = vmatprep.subr.bf16.mxu1 %v1376_v41 }
  0x5d   :  { %1140 = vmatpush3.bf16.msra.mxu0 %v1265_v57 }
  0x5e   :  { %718 = vmatpush1.bf16.msra.mxu1 %v1266_v58  ;;  %1141 = vmatprep.subr.bf16.mxu0 %v1267_v59  ;;  %v1294_v58 = vld [vmem:[%s1554_s5 + $0x30] sm:$0xff]   ;;  %v1295_v59 = vld [vmem:[%s1554_s5 + $0x38] sm:$0xff]  }
  0x5f   :  { %719 = vmatprep.subr.bf16.mxu1 %v1376_v41 }
  0x61   :  { %1142 = vmatpush3.bf16.msra.mxu0 %v1268_v60  ;;  %v1067_v60 = vld [vmem:[%s1553_s4] ss:$0 sm:$0xff]  ;;  %s1379_s4 = smov [#allocation7]  }
  0x62   :  { %720 = vmatpush1.bf16.msra.mxu1 %v1269_v62  ;;  %1143 = vmatprep.subr.bf16.mxu0 %v1270_v0  ;;  %s992_s5 = sshll.u32 %s1379_s4, 4  ;;  %s993_s5 = int_to_ptr.vmem [resolvable:$true] %s992_s5 }
  0x63   :  { %721 = vmatprep.subr.bf16.mxu1 %v1376_v41  ;;  %s1344_s6 = scalar_lea.vmem %s993_s5, 128  ;;  %p1349_p3 = scmp.lt.s32.totalorder %s993_s5, %s993_s5 }
  0x64   :  { %p1345_p2 = scmp.ne.s32.totalorder %s993_s5, %s1344_s6  ;;  %p1350_p4 = scmp.lt.s32.totalorder %s1344_s6, %s1344_s6 }
  0x65   :  { %1144 = vmatpush3.bf16.msra.mxu0 %v1271_v1 }
  0x66   :  { %722 = vmatpush1.bf16.msra.mxu1 %v1272_v2  ;;  %1169 = vmatprep.subr.bf16.mxu0 %v1377_v18  ;;  %p1351_p5 = por %p1350_p4, %p1349_p3 }
  0x67   :  { %723 = vmatprep.subr.bf16.mxu1 %v1376_v41 }
  0x68   :  { %700 = vmatmul.mubr.bf16.vlgmr.msra.gmra.mrb[4].mxu0 %v68_v5  ;;  %p1352_p6 = pnand %p1351_p5, %p1345_p2 }
  0x69   :  { %1170 = vmatpush3.bf16.msra.mxu0 %v1280_v17  ;;  %1185 = vmatprep.mubr.msk.bf16.mxu0 %vm1378_vm2, %v1377_v18 }
  0x6a   :  { %724 = vmatpush1.bf16.msra.mxu1 %v1273_v7  ;;  %1171 = vmatprep.subr.bf16.mxu0 %v1377_v18 }
  0x6b   :  { %725 = vmatprep.subr.bf16.mxu1 %v1376_v41 }
  0x6d   :  { %1172 = vmatpush3.bf16.msra.mxu0 %v1281_v19 }
  0x6e   :  { %726 = vmatpush1.bf16.msra.mxu1 %v1274_v8  ;;  %1173 = vmatprep.subr.bf16.mxu0 %v1377_v18 }
  0x6f   :  { %727 = vmatprep.subr.bf16.mxu1 %v1376_v41 }
  0x71   :  { %1174 = vmatpush3.bf16.msra.mxu0 %v1282_v20 }
  0x72   :  { %728 = vmatpush1.bf16.msra.mxu1 %v1275_v9  ;;  %1175 = vmatprep.subr.bf16.mxu0 %v1377_v18 }
  0x73   :  { %729 = vmatprep.subr.bf16.mxu1 %v1376_v41 }
  0x75   :  { %1176 = vmatpush3.bf16.msra.mxu0 %v1283_v21 }
  0x76   :  { %730 = vmatpush1.bf16.msra.mxu1 %v1276_v10  ;;  %1177 = vmatprep.subr.bf16.mxu0 %v1377_v18 }
  0x77   :  { %731 = vmatprep.subr.bf16.mxu1 %v1376_v41 }
  0x79   :  { %1178 = vmatpush3.bf16.msra.mxu0 %v1284_v22 }
  0x7a   :  { %732 = vmatpush1.bf16.msra.mxu1 %v1277_v11  ;;  %1179 = vmatprep.subr.bf16.mxu0 %v1377_v18 }
  0x7b   :  { %733 = vmatprep.subr.bf16.mxu1 %v1376_v41 }
  0x7d   :  { %1180 = vmatpush3.bf16.msra.mxu0 %v1285_v23 }
  0x7e   :  { %734 = vmatpush1.bf16.msra.mxu1 %v1278_v12  ;;  %1181 = vmatprep.subr.bf16.mxu0 %v1377_v18 }
  0x7f   :  { %735 = vmatprep.subr.bf16.mxu1 %v1376_v41 }
  0x81   :  { %1182 = vmatpush3.bf16.msra.mxu0 %v1286_v24 }
  0x82   :  { %736 = vmatpush1.bf16.msra.mxu1 %v585_v15  ;;  %1183 = vmatprep.subr.bf16.mxu0 %v1377_v18 }
  0x83   :  { %1189 = vmatprep.subr.bf16.mxu1 %v1377_v18 }
  0x85   :  { %740 = vmatmul.mubr.bf16.vlgmr.msra.gmra.mrb[4].mxu1 %v70_v16  ;;  %1184 = vmatpush3.bf16.msra.mxu0 %v1287_v25 }
  0x86   :  { %1205 = vmatprep.mubr.msk.bf16.mxu1 %vm1378_vm2, %v1377_v18  ;;  %1190 = vmatpush3.bf16.msra.mxu1 %v1288_v26 }
  0x87   :  { %1191 = vmatprep.subr.bf16.mxu1 %v1377_v18 }
  0x8a   :  { %1192 = vmatpush3.bf16.msra.mxu1 %v1289_v27 }
  0x8b   :  { %1193 = vmatprep.subr.bf16.mxu1 %v1377_v18 }
  0x8e   :  { %1194 = vmatpush3.bf16.msra.mxu1 %v1290_v28 }
  0x8f   :  { %1195 = vmatprep.subr.bf16.mxu1 %v1377_v18 }
  0x92   :  { %1196 = vmatpush3.bf16.msra.mxu1 %v1291_v29 }
  0x93   :  { %1197 = vmatprep.subr.bf16.mxu1 %v1377_v18 }
  0x96   :  { %1198 = vmatpush3.bf16.msra.mxu1 %v1292_v30 }
  0x97   :  { %1199 = vmatprep.subr.bf16.mxu1 %v1377_v18 }
  0x9a   :  { %1200 = vmatpush3.bf16.msra.mxu1 %v1293_v31 }
  0x9b   :  { %1201 = vmatprep.subr.bf16.mxu1 %v1377_v18 }
  0x9e   :  { %1202 = vmatpush3.bf16.msra.mxu1 %v1294_v58 }
  0x9f   :  { %1203 = vmatprep.subr.bf16.mxu1 %v1377_v18 }
  0xa2   :  { %1204 = vmatpush3.bf16.msra.mxu1 %v1295_v59 }
 0x11b   :  { %v1101_v32 = vpop.f32.mrb[0].mxu0 }
 0x11c   :  { %v1123_v33 = vpop.f32.mrb[0].mxu1  ;;  %v1102_v35 = vpop.f32.mrb[1].mxu0 }
 0x11d   :  { %v1124_v36 = vpop.f32.mrb[1].mxu1  ;;  %v1103_v37 = vadd.f32 %v1102_v35, %v1101_v32  ;;  %v1104_v40 = vpop.f32.mrb[2].mxu0 }
 0x11e   :  { %v1125_v38 = vadd.f32 %v1124_v36, %v1123_v33  ;;  %v1126_v39 = vpop.f32.mrb[2].mxu1  ;;  %v1105_v42 = vpop.f32.mrb[3].mxu0 }
 0x11f   :  { %v1127_v41 = vpop.f32.mrb[3].mxu1  ;;  %v622_v43 = vadd.f32 %v1103_v37, %v1002_v34 }
 0x121   :  { %v662_v44 = vadd.f32 %v1125_v38, %v622_v43 }
 0x13b   :  { %v1145_v45 = vpop.f32.mrb[4].mxu0 }
 0x13c   :  { %v1146_v46 = vpop.f32.mrb[5].mxu0 }
 0x13d   :  { %v1147_v47 = vadd.f32 %v1146_v46, %v1145_v45  ;;  %v1148_v48 = vpop.f32.mrb[6].mxu0 }
 0x13e   :  { %v1149_v49 = vpop.f32.mrb[7].mxu0 }
 0x13f   :  { %v702_v50 = vadd.f32 %v1147_v47, %v662_v44 }
 0x158   :  { %v741_v51 = vpop.f32.mrb[4].mxu1 }
 0x159   :  { %v742_v52 = vadd.f32 %v741_v51, %v702_v50  ;;  %v743_v53 = vpop.f32.mrb[5].mxu1 }
 0x15a   :  { %v744_v54 = vpop.f32.mrb[6].mxu1 }
 0x15b   :  { %v747_v55 = vmax.f32 %v742_v52, 0.0  ;;  %v745_v56 = vpop.f32.mrb[7].mxu1 }
 0x15d   :  { %v748_v57 = vpack.c.bf16 %v747_v55, %v747_v55 }
 0x15f   :  { %1186 = vmatmul.mubr.bf16.vlgmr.msra.gmra.mrb[8].mxu0 %v748_v57 }
 0x232   :  { %v854_v61 = vpop.f32.mrb[8].mxu0 }
 0x233   :  { %v855_v62 = vadd.f32 %v1067_v60, %v854_v61  ;;  %v1187_v63 = vpop.f32.mrb[9].mxu0 }
 0x234   :  { %v857_v0 = vpop.f32.mrb[10].mxu0 }
 0x235   :  { %v860_v1 = vmax.f32 %v855_v62, 0.0  ;;  %v1188_v2 = vpop.f32.mrb[11].mxu0 }
 0x237   :  { %v861_v3 = vpack.c.bf16 %v860_v1, %v860_v1 }
 0x239   :  { %1206 = vmatmul.mubr.bf16.vlgmr.msra.gmra.mrb[8].mxu1 %v861_v3 }
 0x30c   :  { %v967_v5 = vpop.f32.mrb[8].mxu1 }
 0x30d   :  { %v968_v6 = vadd.f32 %v1076_v4, %v967_v5  ;;  %v1207_v7 = vpop.f32.mrb[9].mxu1 }
 0x30e   :  { %v970_v8 = vpop.f32.mrb[10].mxu1 }
 0x30f   :  { %v1208_v9 = vpop.f32.mrb[11].mxu1  ;;  %v974_v10 = vsel %vm973_vm3, %v968_v6, -inf }
 0x310   :  { %975 = vmax.xlane.f32.xlu0 %v974_v10 }
 0x39d   :  { %v976_v11 = vpop.xlane.xlu0 %975 }
 0x39e   :  { %v977_v12 = vsub.f32 %v968_v6, %v976_v11 }
 0x3a0   :  { %v978_v13 = vmul.f32 1.442695, %v977_v12 }
 0x3a2   :  { %1296 = vpow2.f32 %v978_v13 }
 0x3ac   :  { %v1297_v14 = vpop.eup %1296 }
 0x3ad   :  { %v980_v15 = vsel %vm973_vm3, %v1297_v14, 0.0 }
 0x3ae   :  { %981 = vadd.xlane.f32.xlu0 %v980_v15 }
 0x43b   :  { %v982_v16 = vpop.xlane.xlu0 %981 }
 0x43c   :  { %1298 = vrcp.f32 %v982_v16 }
 0x446   :  { %v1299_v17 = vpop.eup %1298 }
 0x447   :  { %v984_v18 = vmul.f32 %v1299_v17, %v1297_v14 }
 0x449   :  { %985 = vst.msk [vmem:[#allocation7] sm:$0xff] %vm973_vm3, %v984_v18 }
 0x44a   :  { %1355 = shalt.err (!%p1352_p6)
}
 0x44b   :  { %s1356_s15 = scalar_lea.hbm %s1556_s7, 128 }
 0x44c   :  { %p1357_p7 = scmp.ne.s32.totalorder %s1556_s7, %s1356_s15  ;;  %p1360_p8 = scmp.lt.u32.totalorder %s1356_s15, %s1556_s7 }
 0x44e   :  { %p1362_p9 = pnand %p1360_p8, %p1357_p7 }
 0x450   :  { %1365 = shalt.err (!%p1362_p9)
}
 0x451   :  { %995 = dma.vmem_to_hbm [thread:$0]  %s993_s5, 128, %s1556_s7, [#allocation4]  }
 0x452   :  { %1370 = dma.done.wait [#allocation4], 128  }
 0x453   :  { %1371 = vsyncadd [#allocation4], 4294967168 }
 0x454   :  { %999 = vsyncpa [#allocation3], 1 }
 0x455   :  { %1000 = vsyncpa [#allocation6], 1 }
 0x456   :  { %1001 = vsyncpa [#allocation4], 1 }

</bundles_post_ra>
